<compile_context>
chip_gen: v7x
topology: tpu7x:2x2x1
jax: 0.10.0
libtpu: 0.0.40
codegen_flags: <defaults>
</compile_context>

<pallas_src>
import jax
import jax.numpy as jnp
from jax import lax
from jax.experimental import pallas as pl
from jax.experimental.pallas import tpu as pltpu

LANES = 128
MAX_TILE_ROWS = 8192   # (8192, 128) f32 block = 4 MiB per input per grid step


def _round_up(x, m):
    return ((x + m - 1) // m) * m


def _make_kernel(tile_rows, valid_rows, ragged):
    sub = tile_rows // 8  # tile_rows is always a multiple of 8

    def _accumulate(P, G, out_ref):
        Pf = P.astype(jnp.float32)
        Gf = G.astype(jnp.float32)
        # VPU-only partial reduction: collapse sublane-blocks, keep (8, 128)
        # per-lane partials; the single cross-lane reduce happens later in JAX.
        out_ref[0, 0, :, :] = jnp.sum((Pf * Gf).reshape(sub, 8, LANES), axis=0)
        out_ref[0, 1, :, :] = jnp.sum(Pf.reshape(sub, 8, LANES), axis=0)
        out_ref[0, 2, :, :] = jnp.sum(Gf.reshape(sub, 8, LANES), axis=0)

    if not ragged:
        def kernel(yp_ref, yt_ref, out_ref):
            P = yp_ref[...] > 0.5          # compare at native dtype
            G = yt_ref[...] > 0.5
            _accumulate(P, G, out_ref)
        return kernel

    def kernel(yp_ref, yt_ref, out_ref):
        i = pl.program_id(0)
        is_last = i == pl.num_programs(0) - 1

        @pl.when(jnp.logical_not(is_last))
        def _():
            # Fast path: full block, no mask work.
            P = yp_ref[...] > 0.5
            G = yt_ref[...] > 0.5
            _accumulate(P, G, out_ref)

        @pl.when(is_last)
        def _():
            # Last (partial) block: mask rows past the array end.  The padded
            # rows hold undefined data (possibly NaN); the mask is ANDed in
            # BEFORE accumulation, which neutralizes them.
            P = yp_ref[...] > 0.5
            G = yt_ref[...] > 0.5
            row0 = i * tile_rows
            rid = row0 + lax.broadcasted_iota(jnp.int32, (tile_rows, LANES), 0)
            valid = rid < valid_rows
            _accumulate(jnp.logical_and(P, valid),
                        jnp.logical_and(G, valid),
                        out_ref)

    return kernel


def _partial_sums_jnp(xp, xt):
    P = (xp > 0.5).astype(jnp.float32)
    G = (xt > 0.5).astype(jnp.float32)
    return jnp.sum(P * G), jnp.sum(P), jnp.sum(G)


def score_pallas(y_pred, y_true):
    assert y_pred.shape == y_true.shape
    n = int(y_pred.size)
    yp = jnp.reshape(y_pred, (-1,))
    yt = jnp.reshape(y_true, (-1,))

    rows = n // LANES          # rows need NOT be a multiple of 8: only the
    n_k = rows * LANES         # BlockSpec block (tile_rows, 128) must be
                               # (8,128)-divisible, and the last partial block
                               # is masked in-kernel.

    inter = jnp.float32(0.0)
    sp = jnp.float32(0.0)
    sg = jnp.float32(0.0)

    if rows > 0:
        if n_k == n:
            # Contiguous reshape of the full buffer: no copy, no padding.
            yp2 = yp.reshape(rows, LANES)
            yt2 = yt.reshape(rows, LANES)
        else:
            # TODO(synk): prefix slice may copy; only hit when numel % 128 != 0
            # (the epilogue then handles < 128 elements).
            yp2 = yp[:n_k].reshape(rows, LANES)
            yt2 = yt[:n_k].reshape(rows, LANES)

        tile_rows = min(MAX_TILE_ROWS, _round_up(rows, 8))
        num_blocks = pl.cdiv(rows, tile_rows)
        ragged = (rows % tile_rows) != 0

        kernel = _make_kernel(tile_rows, rows, ragged)
        partials = pl.pallas_call(
            kernel,
            out_shape=jax.ShapeDtypeStruct((num_blocks, 3, 8, LANES), jnp.float32),
            grid=(num_blocks,),
            in_specs=[
                pl.BlockSpec((tile_rows, LANES), lambda i: (i, 0)),
                pl.BlockSpec((tile_rows, LANES), lambda i: (i, 0)),
            ],
            out_specs=pl.BlockSpec((1, 3, 8, LANES), lambda i: (i, 0, 0, 0)),
            compiler_params=pltpu.CompilerParams(
                # TODO(synk): if profiling on v7x shows only one TensorCore
                # engaged, switch this axis to pltpu.CORE_PARALLEL.
                dimension_semantics=("parallel",),
                vmem_limit_bytes=32 * 1024 * 1024,
            ),
        )(yp2, yt2)

        psum = jnp.sum(partials, axis=(0, 2, 3))   # -> (3,): inter, sum(P), sum(G)
        inter = inter + psum[0]
        sp = sp + psum[1]
        sg = sg + psum[2]

    if n_k < n:
        # Tiny leftover (< 128 elements): plain JAX epilogue.
        ti, tp, tg = _partial_sums_jnp(yp[n_k:], yt[n_k:])
        inter = inter + ti
        sp = sp + tp
        sg = sg + tg

    dice = (2.0 * inter + 1.0) / (sp + sg + 1.0)
    union = sp + sg - inter
    iou = inter / (union + 1.0)
    alpha, beta = 0.4, 0.3   # gamma = 0.3 is unused in the reference forward
    score = alpha * dice + beta * iou
    return score, dice, iou


def score_ref(y_pred, y_true):
    P = (y_pred > 0.5).astype(jnp.float32)
    G = (y_true > 0.5).astype(jnp.float32)
    inter = jnp.sum(P * G)
    dice = (2.0 * inter + 1.0) / (jnp.sum(P) + jnp.sum(G) + 1.0)
    union = jnp.sum(P) + jnp.sum(G) - inter
    iou = inter / (union + 1.0)
    return 0.4 * dice + 0.3 * iou, dice, iou


if __name__ == "__main__":
    key = jax.random.PRNGKey(0)
    k1, k2, k3, k4 = jax.random.split(key, 4)

    # NCHW inputs, e.g. predicted / ground-truth segmentation maps.
    y_pred = jax.random.uniform(k1, (2, 4, 16, 16), dtype=jnp.float32)
    y_true = jax.random.uniform(k2, (2, 4, 16, 16), dtype=jnp.float32)

    score, dice, iou = score_pallas(y_pred, y_true)
    jax.block_until_ready((score, dice, iou))

    s_ref, d_ref, i_ref = score_ref(y_pred, y_true)
    assert jnp.allclose(score, s_ref, rtol=1e-6, atol=1e-6)
    assert jnp.allclose(dice, d_ref, rtol=1e-6, atol=1e-6)
    assert jnp.allclose(iou, i_ref, rtol=1e-6, atol=1e-6)

    # Second check: ragged shape exercising the masked last block + epilogue.
    y_pred2 = jax.random.uniform(k3, (2, 3, 17, 19), dtype=jnp.float32)
    y_true2 = jax.random.uniform(k4, (2, 3, 17, 19), dtype=jnp.float32)
    score2, dice2, iou2 = score_pallas(y_pred2, y_true2)
    jax.block_until_ready((score2, dice2, iou2))
    s_ref2, d_ref2, i_ref2 = score_ref(y_pred2, y_true2)
    assert jnp.allclose(score2, s_ref2, rtol=1e-6, atol=1e-6)
    assert jnp.allclose(dice2, d_ref2, rtol=1e-6, atol=1e-6)
    assert jnp.allclose(iou2, i_ref2, rtol=1e-6, atol=1e-6)

    print("KERNEL_OK")
</pallas_src>

<mosaic_0001>
module attributes {stable_mosaic.version = 11 : i64} {
  func.func @kernel(%arg0: i32, %arg1: memref<16x128xf32, #tpu.memory_space<vmem>>, %arg2: memref<16x128xf32, #tpu.memory_space<vmem>>, %arg3: memref<1x3x8x128xf32, #tpu.memory_space<vmem>>) attributes {dimension_semantics = [#tpu.dimension_semantics<parallel>], iteration_bounds = array<i64: 1>, scalar_prefetch = 0 : i64, scratch_operands = 0 : i64, tpu.core_type = #tpu.core_type<tc>, window_params = [{transform_indices = @transform_0, window_bounds = array<i64: 16, 128>}, {transform_indices = @transform_1, window_bounds = array<i64: 16, 128>}, {transform_indices = @transform_2, window_bounds = array<i64: 1, 3, 8, 128>}]} {
    %c0 = arith.constant 0 : index
    %c0_0 = arith.constant 0 : index
    %0 = vector.load %arg1[%c0, %c0_0] : memref<16x128xf32, #tpu.memory_space<vmem>>, vector<16x128xf32>
    %cst = arith.constant 5.000000e-01 : f32
    %1 = vector.broadcast %cst : f32 to vector<16x128xf32>
    %2 = arith.cmpf ogt, %0, %1 : vector<16x128xf32>
    %c0_1 = arith.constant 0 : index
    %c0_2 = arith.constant 0 : index
    %3 = vector.load %arg2[%c0_1, %c0_2] : memref<16x128xf32, #tpu.memory_space<vmem>>, vector<16x128xf32>
    %cst_3 = arith.constant 5.000000e-01 : f32
    %4 = vector.broadcast %cst_3 : f32 to vector<16x128xf32>
    %5 = arith.cmpf ogt, %3, %4 : vector<16x128xf32>
    %6 = arith.extui %2 : vector<16x128xi1> to vector<16x128xi32>
    %7 = arith.sitofp %6 : vector<16x128xi32> to vector<16x128xf32>
    %8 = arith.extui %5 : vector<16x128xi1> to vector<16x128xi32>
    %9 = arith.sitofp %8 : vector<16x128xi32> to vector<16x128xf32>
    %10 = arith.mulf %7, %9 : vector<16x128xf32>
    %11 = vector.shape_cast %10 : vector<16x128xf32> to vector<2x8x128xf32>
    %cst_4 = arith.constant dense<0.000000e+00> : vector<8x128xf32>
    %12 = vector.multi_reduction <add>, %11, %cst_4 [0] : vector<2x8x128xf32> to vector<8x128xf32>
    %c0_5 = arith.constant 0 : index
    %c0_6 = arith.constant 0 : index
    %c0_7 = arith.constant 0 : index
    %c0_8 = arith.constant 0 : index
    %13 = vector.load %arg3[%c0_5, %c0_6, %c0_7, %c0_8] : memref<1x3x8x128xf32, #tpu.memory_space<vmem>>, vector<1x1x8x128xf32>
    %14 = vector.shape_cast %13 : vector<1x1x8x128xf32> to vector<8x128xf32>
    %15 = vector.shape_cast %12 : vector<8x128xf32> to vector<1x1x8x128xf32>
    tpu.vector_store %arg3[%c0_5, %c0_6, %c0_7, %c0_8], %15 {strides = array<i32>} : memref<1x3x8x128xf32, #tpu.memory_space<vmem>>, vector<1x1x8x128xf32>,
    %16 = vector.shape_cast %7 : vector<16x128xf32> to vector<2x8x128xf32>
    %cst_9 = arith.constant dense<0.000000e+00> : vector<8x128xf32>
    %17 = vector.multi_reduction <add>, %16, %cst_9 [0] : vector<2x8x128xf32> to vector<8x128xf32>
    %c0_10 = arith.constant 0 : index
    %c1 = arith.constant 1 : index
    %c0_11 = arith.constant 0 : index
    %c0_12 = arith.constant 0 : index
    %18 = vector.load %arg3[%c0_10, %c1, %c0_11, %c0_12] : memref<1x3x8x128xf32, #tpu.memory_space<vmem>>, vector<1x1x8x128xf32>
    %19 = vector.shape_cast %18 : vector<1x1x8x128xf32> to vector<8x128xf32>
    %20 = vector.shape_cast %17 : vector<8x128xf32> to vector<1x1x8x128xf32>
    tpu.vector_store %arg3[%c0_10, %c1, %c0_11, %c0_12], %20 {strides = array<i32>} : memref<1x3x8x128xf32, #tpu.memory_space<vmem>>, vector<1x1x8x128xf32>,
    %21 = vector.shape_cast %9 : vector<16x128xf32> to vector<2x8x128xf32>
    %cst_13 = arith.constant dense<0.000000e+00> : vector<8x128xf32>
    %22 = vector.multi_reduction <add>, %21, %cst_13 [0] : vector<2x8x128xf32> to vector<8x128xf32>
    %c0_14 = arith.constant 0 : index
    %c2 = arith.constant 2 : index
    %c0_15 = arith.constant 0 : index
    %c0_16 = arith.constant 0 : index
    %23 = vector.load %arg3[%c0_14, %c2, %c0_15, %c0_16] : memref<1x3x8x128xf32, #tpu.memory_space<vmem>>, vector<1x1x8x128xf32>
    %24 = vector.shape_cast %23 : vector<1x1x8x128xf32> to vector<8x128xf32>
    %25 = vector.shape_cast %22 : vector<8x128xf32> to vector<1x1x8x128xf32>
    tpu.vector_store %arg3[%c0_14, %c2, %c0_15, %c0_16], %25 {strides = array<i32>} : memref<1x3x8x128xf32, #tpu.memory_space<vmem>>, vector<1x1x8x128xf32>,
    return
  }
  func.func @transform_0(%arg0: i32) -> (i32, i32) {
    %c0_i32 = arith.constant 0 : i32
    %c0_i32_0 = arith.constant 0 : i32
    return %arg0, %c0_i32 : i32, i32
  }
  func.func @transform_1(%arg0: i32) -> (i32, i32) {
    %c0_i32 = arith.constant 0 : i32
    %c0_i32_0 = arith.constant 0 : i32
    return %arg0, %c0_i32 : i32, i32
  }
  func.func @transform_2(%arg0: i32) -> (i32, i32, i32, i32) {
    %c0_i32 = arith.constant 0 : i32
    %c0_i32_0 = arith.constant 0 : i32
    %c0_i32_1 = arith.constant 0 : i32
    %c0_i32_2 = arith.constant 0 : i32
    return %arg0, %c0_i32, %c0_i32_0, %c0_i32_1 : i32, i32, i32, i32
  }
}

</mosaic_0001>

<bundles_post_ra>
// kernel: tpu_custom_call.1
= control target key start
LH: loop header
LB: loop body
LE: loop exit
PB: predicated region body
PF: predicated region fallthrough
CT: control target
= control target key end

     0   :  { %7 = vsyncpa [#allocation3], 0  ;;  %s232_s0 = inlined_call_operand.hbm [shape: f32[16,128], index: 0, kind: input, shape index: {}]   ;;  %s233_s1 = inlined_call_operand.hbm [shape: f32[16,128], index: 1, kind: input, shape index: {}]   ;;  %s234_s2 = inlined_call_operand.hbm [shape: f32[1,3,8,128], index: 2, kind: output, shape index: {}]  }
   0x1   :  { %8 = vsyncpa [#allocation6], 0 }
   0x2   :  { %9 = vsyncpa [#allocation4], 0  ;;  %s166_s9 = smov [#allocation2]   ;;  %s94_s13 = scalar_lea.hbm %s232_s0, 256 }
   0x3   :  { %s15_s10 = sshll.u32 %s166_s9, 4  ;;  %p95_p0 = scmp.ne.s32.totalorder %s232_s0, %s94_s13  ;;  %s16_s10 = int_to_ptr.vmem [resolvable:$true] %s15_s10 }
   0x4   :  { %p98_p1 = scmp.lt.u32.totalorder %s94_s13, %s232_s0 }
   0x6   :  { %p100_p2 = pnand %p98_p1, %p95_p0 }
   0x8   :  { %103 = shalt.err (!%p100_p2)
}
   0x9   :  { %s104_s18 = scalar_lea.vmem %s16_s10, 256  ;;  %p109_p4 = scmp.lt.s32.totalorder %s16_s10, %s16_s10 }
   0xa   :  { %p105_p3 = scmp.ne.s32.totalorder %s16_s10, %s104_s18  ;;  %p110_p5 = scmp.lt.s32.totalorder %s104_s18, %s104_s18 }
   0xc   :  { %p111_p6 = por %p110_p5, %p109_p4 }
   0xe   :  { %p112_p7 = pnand %p111_p6, %p105_p3 }
  0x10   :  { %115 = shalt.err (!%p112_p7)
}
  0x11   :  { %s167_s19 = smov 128   ;;  %s168_s20 = smov 8  }
  0x12   :  { %21 = dma.hbm_to_vmem [thread:$0]  %s232_s0, 256, %s16_s10, [#allocation3], %s167_s19, %s167_s19, %s168_s20  }
  0x13   :  { %s169_s23 = smov [#allocation5]   ;;  %s116_s27 = scalar_lea.hbm %s233_s1, 256 }
  0x14   :  { %s27_s24 = sshll.u32 %s169_s23, 4  ;;  %p117_p8 = scmp.ne.s32.totalorder %s233_s1, %s116_s27  ;;  %s28_s24 = int_to_ptr.vmem [resolvable:$true] %s27_s24 }
  0x15   :  { %p120_p9 = scmp.lt.u32.totalorder %s116_s27, %s233_s1 }
  0x17   :  { %p122_p10 = pnand %p120_p9, %p117_p8 }
  0x19   :  { %125 = shalt.err (!%p122_p10)
}
  0x1a   :  { %s126_s4 = scalar_lea.vmem %s28_s24, 256  ;;  %p131_p12 = scmp.lt.s32.totalorder %s28_s24, %s28_s24 }
  0x1b   :  { %p127_p11 = scmp.ne.s32.totalorder %s28_s24, %s126_s4  ;;  %p132_p13 = scmp.lt.s32.totalorder %s126_s4, %s126_s4 }
  0x1d   :  { %p133_p0 = por %p132_p13, %p131_p12 }
  0x1f   :  { %p134_p1 = pnand %p133_p0, %p127_p11 }
  0x21   :  { %137 = shalt.err (!%p134_p1)
}
  0x22   :  { %33 = dma.hbm_to_vmem [thread:$0]  %s233_s1, 256, %s28_s24, [#allocation6], %s167_s19, %s167_s19, %s168_s20  }
  0x23   :  { %160 = dma.done.wait [#allocation3], 256  }
  0x24   :  { %161 = vsyncadd [#allocation3], 4294967040 }
  0x25   :  { %162 = dma.done.wait [#allocation6], 256  }
  0x26   :  { %163 = vsyncadd [#allocation6], 4294967040  ;;  %v40_v0 = vld [vmem:[#allocation2] sm:$0xff]  ;;  %v41_v1 = vld [vmem:[#allocation2 + $0x8] sm:$0xff]  ;;  %v170_v4 = vmov 0.0   ;;  %s171_s1 = smov [#allocation7]  }
  0x27   :  { %v44_v2 = vld [vmem:[#allocation5] sm:$0xff]  ;;  %vm42_vm0 = vcmp.gt.f32.partialorder %v40_v0, 0.5  ;;  %vm43_vm1 = vcmp.gt.f32.partialorder %v41_v1, 0.5  ;;  %v45_v3 = vld [vmem:[#allocation5 + $0x8] sm:$0xff]  ;;  %s71_s6 = sshll.u32 %s171_s1, 4  ;;  %s72_s6 = int_to_ptr.vmem [resolvable:$true] %s71_s6 }
  0x28   :  { %vm46_vm2 = vcmp.gt.f32.partialorder %v44_v2, 0.5  ;;  %vm47_vm3 = vcmp.gt.f32.partialorder %v45_v3, 0.5  ;;  %v84_v5 = vsel %vm42_vm0, 1.0, %v170_v4  ;;  %v85_v6 = vsel %vm43_vm1, 1.0, %v170_v4  ;;  %s138_s7 = scalar_lea.vmem %s72_s6, 384  ;;  %p143_p3 = scmp.lt.s32.totalorder %s72_s6, %s72_s6 }
  0x29   :  { %v86_v7 = vsel %vm46_vm2, 1.0, %v170_v4  ;;  %v87_v8 = vsel %vm47_vm3, 1.0, %v170_v4  ;;  %v60_v10 = vadd.f32 %v85_v6, %v84_v5  ;;  %p139_p2 = scmp.ne.s32.totalorder %s72_s6, %s138_s7  ;;  %p144_p4 = scmp.lt.s32.totalorder %s138_s7, %s138_s7 }
  0x2a   :  { %v56_v9 = vmul.f32 %v86_v7, %v84_v5  ;;  %v57_v11 = vmul.f32 %v87_v8, %v85_v6  ;;  %v63_v12 = vadd.f32 %v87_v8, %v86_v7 }
  0x2b   :  { %62 = vst [vmem:[#allocation7 + $0x8] sm:$0xff] %v60_v10  ;;  %p145_p5 = por %p144_p4, %p143_p3 }
  0x2c   :  { %v58_v13 = vadd.f32 %v57_v11, %v56_v9  ;;  %65 = vst [vmem:[#allocation7 + $0x10] sm:$0xff] %v63_v12 }
  0x2d   :  { %p146_p6 = pnand %p145_p5, %p139_p2 }
  0x2e   :  { %59 = vst [vmem:[#allocation7] sm:$0xff] %v58_v13 }
  0x2f   :  { %149 = shalt.err (!%p146_p6)
}
  0x30   :  { %s150_s10 = scalar_lea.hbm %s234_s2, 384 }
  0x31   :  { %p151_p7 = scmp.ne.s32.totalorder %s234_s2, %s150_s10  ;;  %p154_p8 = scmp.lt.u32.totalorder %s150_s10, %s234_s2 }
  0x33   :  { %p156_p9 = pnand %p154_p8, %p151_p7 }
  0x35   :  { %159 = shalt.err (!%p156_p9)
}
  0x36   :  { %77 = dma.vmem_to_hbm [thread:$0]  %s72_s6, 384, %s234_s2, [#allocation4], %s167_s19, %s167_s19, %s168_s20  }
  0x37   :  { %164 = dma.done.wait [#allocation4], 384  }
  0x38   :  { %165 = vsyncadd [#allocation4], 4294966912 }
  0x39   :  { %81 = vsyncpa [#allocation3], 1 }
  0x3a   :  { %82 = vsyncpa [#allocation6], 1 }
  0x3b   :  { %83 = vsyncpa [#allocation4], 1 }

</bundles_post_ra>
